<compile_context>
chip_gen: v7x
topology: tpu7x:2x2x1
jax: 0.10.0
libtpu: 0.0.40
codegen_flags: <defaults>
</compile_context>

<pallas_src>
import functools

import jax
import jax.numpy as jnp
from jax import lax
from jax.experimental import pallas as pl
from jax.experimental.pallas import tpu as pltpu


# ----------------------------------------------------------------------------
# Fused bidirectional LSTM layer kernel (optionally fused with masked max-pool)
# ----------------------------------------------------------------------------
def _bilstm_layer_kernel(lens_ref, x_ref,
                         wihf_ref, whhf_ref, bf_ref,
                         wihb_ref, whhb_ref, bb_ref,
                         out_ref,
                         xgf_scr, xgb_scr,
                         hf_scr, cf_scr, hb_scr, cb_scr,
                         of_scr, ob_scr,
                         *, hidden, n_batch, n_time, pool, pad_value):
    """One bidirectional LSTM layer over the whole sequence.

    lens_ref : (Bp, 1) int32       valid lengths (padded batch rows have len 0)
    x_ref    : (T*Bp, Din)         layer input, row = t*Bp + b
    wih*_ref : (Din, 4H)           input->gates weights (transposed PyTorch)
    whh*_ref : (H, 4H)             hidden->gates weights (transposed PyTorch)
    b*_ref   : (1, 4H)             bias_ih + bias_hh
    out_ref  : (T*Bp, 2H) if not pool else (Bp, 2H)
    of/ob_scr: per-direction output accumulator:
               (T*Bp, H) hidden sequence (not pool) or (Bp, H) running max (pool)
    """
    H = hidden
    Bp = n_batch
    T = n_time

    # --- hoisted input projection: one large-M MXU pass per direction -------
    x = x_ref[...]                                               # (T*Bp, Din)
    xgf_scr[...] = (jnp.dot(x, wihf_ref[...],
                            preferred_element_type=jnp.float32) + bf_ref[...])
    xgb_scr[...] = (jnp.dot(x, wihb_ref[...],
                            preferred_element_type=jnp.float32) + bb_ref[...])

    # --- loop-invariant loads ------------------------------------------------
    whh_f = whhf_ref[...]                                        # (H, 4H)
    whh_b = whhb_ref[...]
    lens = lens_ref[...]                                         # (Bp, 1) int32

    hf_scr[...] = jnp.zeros_like(hf_scr)
    cf_scr[...] = jnp.zeros_like(cf_scr)
    hb_scr[...] = jnp.zeros_like(hb_scr)
    cb_scr[...] = jnp.zeros_like(cb_scr)
    if pool:
        of_scr[...] = jnp.full_like(of_scr, pad_value)
        ob_scr[...] = jnp.full_like(ob_scr, pad_value)

    def cell(gates, h_prev, c_prev, valid):
        i = jax.nn.sigmoid(gates[:, 0 * H:1 * H])
        f = jax.nn.sigmoid(gates[:, 1 * H:2 * H])
        g = jnp.tanh(gates[:, 2 * H:3 * H])
        o = jax.nn.sigmoid(gates[:, 3 * H:4 * H])
        c_new = f * c_prev + i * g
        h_new = o * jnp.tanh(c_new)
        # pack_padded semantics: state is frozen past each sequence's length.
        return jnp.where(valid, h_new, h_prev), jnp.where(valid, c_new, c_prev)

    def step(t, carry):
        # Forward direction at time t, backward direction at time T-1-t.  The
        # two recurrences are independent, so interleaving them in one loop
        # body overlaps their h @ W_hh matmuls on the MXU.
        tb = T - 1 - t
        row_f = pl.multiple_of(t * Bp, Bp)
        row_b = pl.multiple_of(tb * Bp, Bp)

        g_f = xgf_scr[pl.ds(row_f, Bp), :] + jnp.dot(
            hf_scr[...], whh_f, preferred_element_type=jnp.float32)
        g_b = xgb_scr[pl.ds(row_b, Bp), :] + jnp.dot(
            hb_scr[...], whh_b, preferred_element_type=jnp.float32)

        valid_f = t < lens                                       # (Bp, 1) bool
        valid_b = tb < lens
        h_f, c_f = cell(g_f, hf_scr[...], cf_scr[...], valid_f)
        h_b, c_b = cell(g_b, hb_scr[...], cb_scr[...], valid_b)
        hf_scr[...] = h_f
        cf_scr[...] = c_f
        hb_scr[...] = h_b
        cb_scr[...] = c_b

        if pool:
            # fused masked max-pool: only valid timesteps can raise the max,
            # reproducing pad_packed(padding_value=-1e9) + max over time.
            of_scr[...] = jnp.where(valid_f, jnp.maximum(of_scr[...], h_f),
                                    of_scr[...])
            ob_scr[...] = jnp.where(valid_b, jnp.maximum(ob_scr[...], h_b),
                                    ob_scr[...])
        else:
            of_scr[pl.ds(row_f, Bp), :] = h_f
            ob_scr[pl.ds(row_b, Bp), :] = h_b
        return carry

    lax.fori_loop(0, T, step, 0)

    # Single write of both direction halves (forward lanes [0,H), backward [H,2H)).
    out_ref[:, :H] = of_scr[...].astype(out_ref.dtype)
    out_ref[:, H:] = ob_scr[...].astype(out_ref.dtype)


# ----------------------------------------------------------------------------
# Pallas wrapper: one call per layer (last layer also pools)
# ----------------------------------------------------------------------------
def bilstm_layer(x2d, lens_col, p, *, hidden, seq_len, batch_pad, pool,
                 pad_value=-1e9):
    TB, Din = x2d.shape
    H = hidden
    Bp = batch_pad
    T = seq_len
    assert TB == T * Bp
    out_rows = Bp if pool else TB          # pooled (Bp, 2H) vs sequence (T*Bp, 2H)
    acc_rows = Bp if pool else TB

    kernel = functools.partial(
        _bilstm_layer_kernel, hidden=H, n_batch=Bp, n_time=T,
        pool=pool, pad_value=pad_value)

    return pl.pallas_call(
        kernel,
        out_shape=jax.ShapeDtypeStruct((out_rows, 2 * H), jnp.float32),
        grid=(1,),
        in_specs=[
            pl.BlockSpec((Bp, 1), lambda i: (0, 0)),          # lens
            pl.BlockSpec((TB, Din), lambda i: (0, 0)),        # x
            pl.BlockSpec((Din, 4 * H), lambda i: (0, 0)),     # wih fwd
            pl.BlockSpec((H, 4 * H), lambda i: (0, 0)),       # whh fwd
            pl.BlockSpec((1, 4 * H), lambda i: (0, 0)),       # bias fwd
            pl.BlockSpec((Din, 4 * H), lambda i: (0, 0)),     # wih bwd
            pl.BlockSpec((H, 4 * H), lambda i: (0, 0)),       # whh bwd
            pl.BlockSpec((1, 4 * H), lambda i: (0, 0)),       # bias bwd
        ],
        out_specs=pl.BlockSpec((out_rows, 2 * H), lambda i: (0, 0)),
        scratch_shapes=[
            pltpu.VMEM((TB, 4 * H), jnp.float32),             # x-gates fwd
            pltpu.VMEM((TB, 4 * H), jnp.float32),             # x-gates bwd
            pltpu.VMEM((Bp, H), jnp.float32),                 # h fwd
            pltpu.VMEM((Bp, H), jnp.float32),                 # c fwd
            pltpu.VMEM((Bp, H), jnp.float32),                 # h bwd
            pltpu.VMEM((Bp, H), jnp.float32),                 # c bwd
            pltpu.VMEM((acc_rows, H), jnp.float32),           # output acc fwd
            pltpu.VMEM((acc_rows, H), jnp.float32),           # output acc bwd
        ],
        compiler_params=pltpu.CompilerParams(
            dimension_semantics=("arbitrary",)),
    )(lens_col, x2d, p['wih_f'], p['whh_f'], p['b_f'],
      p['wih_b'], p['whh_b'], p['b_b'])


def infnet_forward(sent, sent_len, params, hidden, num_layers):
    """Equivalent of baseline_Infnet.forward with pool_type='max' (eval mode)."""
    T, B, Din = sent.shape
    Bp = ((B + 7) // 8) * 8                # pad batch to the 8-sublane minimum
    sent_len = sent_len.astype(jnp.int32)
    if Bp != B:
        sent = jnp.pad(sent, ((0, 0), (0, Bp - B), (0, 0)))
        sent_len = jnp.pad(sent_len, (0, Bp - B))   # len 0 -> rows stay inert
    lens_col = sent_len.reshape(Bp, 1)
    x = sent.reshape(T * Bp, Din)          # time-major rows; free bitcast in XLA

    for l in range(num_layers):
        x = bilstm_layer(x, lens_col, params[l], hidden=hidden, seq_len=T,
                         batch_pad=Bp, pool=(l == num_layers - 1))
    return x[:B]                           # (B, 2H) pooled embedding


# ----------------------------------------------------------------------------
# Deterministic parameter init (PyTorch nn.LSTM shapes, U(-1/sqrt(H), 1/sqrt(H)))
# ----------------------------------------------------------------------------
def init_params(key, word_dim, hidden, num_layers):
    params = []
    bound = 1.0 / float(hidden) ** 0.5
    for l in range(num_layers):
        din = word_dim if l == 0 else 2 * hidden
        layer = {}
        for d in ('f', 'b'):
            key, k1, k2, k3, k4 = jax.random.split(key, 5)
            layer['wih_' + d] = jax.random.uniform(
                k1, (din, 4 * hidden), jnp.float32, -bound, bound)
            layer['whh_' + d] = jax.random.uniform(
                k2, (hidden, 4 * hidden), jnp.float32, -bound, bound)
            b_ih = jax.random.uniform(k3, (4 * hidden,), jnp.float32, -bound, bound)
            b_hh = jax.random.uniform(k4, (4 * hidden,), jnp.float32, -bound, bound)
            layer['b_' + d] = (b_ih + b_hh).reshape(1, 4 * hidden)
        params.append(layer)
    return params


# ----------------------------------------------------------------------------
# Pure-JAX reference (same masked-packed semantics) for a correctness check
# ----------------------------------------------------------------------------
def _lstm_dir_ref(x, lens_col, w_ih, w_hh, b, hidden, reverse):
    T, B, _ = x.shape
    H = hidden

    def step(carry, t):
        h, c = carry
        tt = (T - 1 - t) if reverse else t
        x_t = x[tt]
        gates = x_t @ w_ih + h @ w_hh + b
        i = jax.nn.sigmoid(gates[:, :H])
        f = jax.nn.sigmoid(gates[:, H:2 * H])
        g = jnp.tanh(gates[:, 2 * H:3 * H])
        o = jax.nn.sigmoid(gates[:, 3 * H:])
        c_new = f * c + i * g
        h_new = o * jnp.tanh(c_new)
        valid = tt < lens_col
        h = jnp.where(valid, h_new, h)
        c = jnp.where(valid, c_new, c)
        return (h, c), h

    init = (jnp.zeros((B, H), jnp.float32), jnp.zeros((B, H), jnp.float32))
    _, hs = lax.scan(step, init, jnp.arange(T))
    if reverse:
        hs = hs[::-1]
    return hs


def infnet_ref(sent, sent_len, params, hidden, num_layers, pad=-1e9):
    lens_col = sent_len.reshape(-1, 1).astype(jnp.int32)
    x = sent
    for l in range(num_layers):
        p = params[l]
        hf = _lstm_dir_ref(x, lens_col, p['wih_f'], p['whh_f'], p['b_f'], hidden, False)
        hb = _lstm_dir_ref(x, lens_col, p['wih_b'], p['whh_b'], p['b_b'], hidden, True)
        x = jnp.concatenate([hf, hb], axis=-1)
    T = x.shape[0]
    tpos = jnp.arange(T)[:, None, None]
    masked = jnp.where(tpos < lens_col[None, :, :], x, pad)
    return masked.max(axis=0)


# ----------------------------------------------------------------------------
if __name__ == "__main__":
    word_dim, lstm_hidden, num_layer = 16, 32, 2
    T, B = 8, 4

    key = jax.random.PRNGKey(0)
    k_sent, k_params = jax.random.split(key)
    sent = jax.random.normal(k_sent, (T, B, word_dim), jnp.float32)
    sent_len = jnp.array([8, 5, 3, 6], dtype=jnp.int32)

    params = init_params(k_params, word_dim, lstm_hidden, num_layer)

    emb = infnet_forward(sent, sent_len, params, lstm_hidden, num_layer)
    emb = jax.block_until_ready(emb)

    ref = infnet_ref(sent, sent_len, params, lstm_hidden, num_layer)
    assert emb.shape == (B, 2 * lstm_hidden)
    assert jnp.allclose(emb, ref, atol=2e-3, rtol=2e-3), "mismatch vs JAX reference"

    print("KERNEL_OK")
</pallas_src>

<mosaic_0001>
module attributes {stable_mosaic.version = 11 : i64} {
  func.func @_bilstm_layer_kernel(%arg0: i32, %arg1: memref<8x1xi32, #tpu.memory_space<vmem>>, %arg2: memref<64x16xf32, #tpu.memory_space<vmem>>, %arg3: memref<16x128xf32, #tpu.memory_space<vmem>>, %arg4: memref<32x128xf32, #tpu.memory_space<vmem>>, %arg5: memref<1x128xf32, #tpu.memory_space<vmem>>, %arg6: memref<16x128xf32, #tpu.memory_space<vmem>>, %arg7: memref<32x128xf32, #tpu.memory_space<vmem>>, %arg8: memref<1x128xf32, #tpu.memory_space<vmem>>, %arg9: memref<64x64xf32, #tpu.memory_space<vmem>>, %arg10: memref<64x128xf32, #tpu.memory_space<vmem>>, %arg11: memref<64x128xf32, #tpu.memory_space<vmem>>, %arg12: memref<8x32xf32, #tpu.memory_space<vmem>>, %arg13: memref<8x32xf32, #tpu.memory_space<vmem>>, %arg14: memref<8x32xf32, #tpu.memory_space<vmem>>, %arg15: memref<8x32xf32, #tpu.memory_space<vmem>>, %arg16: memref<64x32xf32, #tpu.memory_space<vmem>>, %arg17: memref<64x32xf32, #tpu.memory_space<vmem>>) attributes {dimension_semantics = [#tpu.dimension_semantics<arbitrary>], iteration_bounds = array<i64: 1>, scalar_prefetch = 0 : i64, scratch_operands = 8 : i64, tpu.core_type = #tpu.core_type<tc>, window_params = [{pipeline_mode = #tpu.pipeline_mode<synchronous>, transform_indices = @transform_0, window_bounds = array<i64: 8, 1>}, {pipeline_mode = #tpu.pipeline_mode<synchronous>, transform_indices = @transform_1, window_bounds = array<i64: 64, 16>}, {pipeline_mode = #tpu.pipeline_mode<synchronous>, transform_indices = @transform_2, window_bounds = array<i64: 16, 128>}, {pipeline_mode = #tpu.pipeline_mode<synchronous>, transform_indices = @transform_3, window_bounds = array<i64: 32, 128>}, {pipeline_mode = #tpu.pipeline_mode<synchronous>, transform_indices = @transform_4, window_bounds = array<i64: 1, 128>}, {pipeline_mode = #tpu.pipeline_mode<synchronous>, transform_indices = @transform_5, window_bounds = array<i64: 16, 128>}, {pipeline_mode = #tpu.pipeline_mode<synchronous>, transform_indices = @transform_6, window_bounds = array<i64: 32, 128>}, {pipeline_mode = #tpu.pipeline_mode<synchronous>, transform_indices = @transform_7, window_bounds = array<i64: 1, 128>}, {pipeline_mode = #tpu.pipeline_mode<synchronous>, transform_indices = @transform_8, window_bounds = array<i64: 64, 64>}]} {
    %c0 = arith.constant 0 : index
    %c0_0 = arith.constant 0 : index
    %0 = vector.load %arg2[%c0, %c0_0] : memref<64x16xf32, #tpu.memory_space<vmem>>, vector<64x16xf32>
    %c0_1 = arith.constant 0 : index
    %c0_2 = arith.constant 0 : index
    %1 = vector.load %arg3[%c0_1, %c0_2] : memref<16x128xf32, #tpu.memory_space<vmem>>, vector<16x128xf32>
    %cst = arith.constant dense<0.000000e+00> : vector<64x128xf32>
    %2 = tpu.matmul %0, %1, %cst {dimension_numbers = #tpu.dot_dimension_numbers<[1], [0], [0], [1], [0, 0, 1, 1], [], []>} : vector<64x16xf32>, vector<16x128xf32>, vector<64x128xf32> -> vector<64x128xf32>
    %c0_3 = arith.constant 0 : index
    %c0_4 = arith.constant 0 : index
    %3 = vector.load %arg5[%c0_3, %c0_4] : memref<1x128xf32, #tpu.memory_space<vmem>>, vector<1x128xf32>
    %4 = vector.broadcast %3 : vector<1x128xf32> to vector<64x128xf32>
    %5 = arith.addf %2, %4 : vector<64x128xf32>
    %c0_5 = arith.constant 0 : index
    %c0_6 = arith.constant 0 : index
    %6 = vector.load %arg10[%c0_5, %c0_6] : memref<64x128xf32, #tpu.memory_space<vmem>>, vector<64x128xf32>
    tpu.vector_store %arg10[%c0_5, %c0_6], %5 {strides = array<i32>} : memref<64x128xf32, #tpu.memory_space<vmem>>, vector<64x128xf32>,
    %c0_7 = arith.constant 0 : index
    %c0_8 = arith.constant 0 : index
    %7 = vector.load %arg6[%c0_7, %c0_8] : memref<16x128xf32, #tpu.memory_space<vmem>>, vector<16x128xf32>
    %cst_9 = arith.constant dense<0.000000e+00> : vector<64x128xf32>
    %8 = tpu.matmul %0, %7, %cst_9 {dimension_numbers = #tpu.dot_dimension_numbers<[1], [0], [0], [1], [0, 0, 1, 1], [], []>} : vector<64x16xf32>, vector<16x128xf32>, vector<64x128xf32> -> vector<64x128xf32>
    %c0_10 = arith.constant 0 : index
    %c0_11 = arith.constant 0 : index
    %9 = vector.load %arg8[%c0_10, %c0_11] : memref<1x128xf32, #tpu.memory_space<vmem>>, vector<1x128xf32>
    %10 = vector.broadcast %9 : vector<1x128xf32> to vector<64x128xf32>
    %11 = arith.addf %8, %10 : vector<64x128xf32>
    %c0_12 = arith.constant 0 : index
    %c0_13 = arith.constant 0 : index
    %12 = vector.load %arg11[%c0_12, %c0_13] : memref<64x128xf32, #tpu.memory_space<vmem>>, vector<64x128xf32>
    tpu.vector_store %arg11[%c0_12, %c0_13], %11 {strides = array<i32>} : memref<64x128xf32, #tpu.memory_space<vmem>>, vector<64x128xf32>,
    %c0_14 = arith.constant 0 : index
    %c0_15 = arith.constant 0 : index
    %13 = vector.load %arg4[%c0_14, %c0_15] : memref<32x128xf32, #tpu.memory_space<vmem>>, vector<32x128xf32>
    %c0_16 = arith.constant 0 : index
    %c0_17 = arith.constant 0 : index
    %14 = vector.load %arg7[%c0_16, %c0_17] : memref<32x128xf32, #tpu.memory_space<vmem>>, vector<32x128xf32>
    %c0_18 = arith.constant 0 : index
    %c0_19 = arith.constant 0 : index
    %15 = vector.load %arg1[%c0_18, %c0_19] : memref<8x1xi32, #tpu.memory_space<vmem>>, vector<8x1xi32>
    %cst_20 = arith.constant 0.000000e+00 : f32
    %16 = vector.broadcast %cst_20 : f32 to vector<8x32xf32>
    %c0_21 = arith.constant 0 : index
    %c0_22 = arith.constant 0 : index
    %17 = vector.load %arg12[%c0_21, %c0_22] : memref<8x32xf32, #tpu.memory_space<vmem>>, vector<8x32xf32>
    tpu.vector_store %arg12[%c0_21, %c0_22], %16 {strides = array<i32>} : memref<8x32xf32, #tpu.memory_space<vmem>>, vector<8x32xf32>,
    %cst_23 = arith.constant 0.000000e+00 : f32
    %18 = vector.broadcast %cst_23 : f32 to vector<8x32xf32>
    %c0_24 = arith.constant 0 : index
    %c0_25 = arith.constant 0 : index
    %19 = vector.load %arg13[%c0_24, %c0_25] : memref<8x32xf32, #tpu.memory_space<vmem>>, vector<8x32xf32>
    tpu.vector_store %arg13[%c0_24, %c0_25], %18 {strides = array<i32>} : memref<8x32xf32, #tpu.memory_space<vmem>>, vector<8x32xf32>,
    %cst_26 = arith.constant 0.000000e+00 : f32
    %20 = vector.broadcast %cst_26 : f32 to vector<8x32xf32>
    %c0_27 = arith.constant 0 : index
    %c0_28 = arith.constant 0 : index
    %21 = vector.load %arg14[%c0_27, %c0_28] : memref<8x32xf32, #tpu.memory_space<vmem>>, vector<8x32xf32>
    tpu.vector_store %arg14[%c0_27, %c0_28], %20 {strides = array<i32>} : memref<8x32xf32, #tpu.memory_space<vmem>>, vector<8x32xf32>,
    %cst_29 = arith.constant 0.000000e+00 : f32
    %22 = vector.broadcast %cst_29 : f32 to vector<8x32xf32>
    %c0_30 = arith.constant 0 : index
    %c0_31 = arith.constant 0 : index
    %23 = vector.load %arg15[%c0_30, %c0_31] : memref<8x32xf32, #tpu.memory_space<vmem>>, vector<8x32xf32>
    tpu.vector_store %arg15[%c0_30, %c0_31], %22 {strides = array<i32>} : memref<8x32xf32, #tpu.memory_space<vmem>>, vector<8x32xf32>,
    %c0_i32 = arith.constant 0 : i32
    %c8_i32 = arith.constant 8 : i32
    %24 = arith.addi %c0_i32, %c8_i32 : i32
    %c1_i32 = arith.constant 1 : i32
    scf.for %arg18 = %c0_i32 to %24 step %c1_i32  : i32 {
      %c7_i32 = arith.constant 7 : i32
      %29 = arith.subi %c7_i32, %arg18 : i32
      %c8_i32_40 = arith.constant 8 : i32
      %30 = arith.muli %arg18, %c8_i32_40 : i32
      %31 = tpu.assume_multiple %30, 8 : i32
      %c8_i32_41 = arith.constant 8 : i32
      %32 = arith.muli %29, %c8_i32_41 : i32
      %33 = tpu.assume_multiple %32, 8 : i32
      %34 = arith.index_cast %31 : i32 to index
      %c0_42 = arith.constant 0 : index
      %35 = vector.load %arg10[%34, %c0_42] : memref<64x128xf32, #tpu.memory_space<vmem>>, vector<8x128xf32>
      %c0_43 = arith.constant 0 : index
      %c0_44 = arith.constant 0 : index
      %36 = vector.load %arg12[%c0_43, %c0_44] : memref<8x32xf32, #tpu.memory_space<vmem>>, vector<8x32xf32>
      %cst_45 = arith.constant dense<0.000000e+00> : vector<8x128xf32>
      %37 = tpu.matmul %36, %13, %cst_45 {dimension_numbers = #tpu.dot_dimension_numbers<[1], [0], [0], [1], [0, 0, 1, 1], [], []>} : vector<8x32xf32>, vector<32x128xf32>, vector<8x128xf32> -> vector<8x128xf32>
      %38 = arith.addf %35, %37 : vector<8x128xf32>
      %39 = arith.index_cast %33 : i32 to index
      %c0_46 = arith.constant 0 : index
      %40 = vector.load %arg11[%39, %c0_46] : memref<64x128xf32, #tpu.memory_space<vmem>>, vector<8x128xf32>
      %c0_47 = arith.constant 0 : index
      %c0_48 = arith.constant 0 : index
      %41 = vector.load %arg14[%c0_47, %c0_48] : memref<8x32xf32, #tpu.memory_space<vmem>>, vector<8x32xf32>
      %cst_49 = arith.constant dense<0.000000e+00> : vector<8x128xf32>
      %42 = tpu.matmul %41, %14, %cst_49 {dimension_numbers = #tpu.dot_dimension_numbers<[1], [0], [0], [1], [0, 0, 1, 1], [], []>} : vector<8x32xf32>, vector<32x128xf32>, vector<8x128xf32> -> vector<8x128xf32>
      %43 = arith.addf %40, %42 : vector<8x128xf32>
      %44 = vector.broadcast %arg18 : i32 to vector<8x1xi32>
      %45 = arith.cmpi slt, %44, %15 : vector<8x1xi32>
      %46 = vector.broadcast %29 : i32 to vector<8x1xi32>
      %47 = arith.cmpi slt, %46, %15 : vector<8x1xi32>
      %c0_50 = arith.constant 0 : index
      %c0_51 = arith.constant 0 : index
      %48 = vector.load %arg12[%c0_50, %c0_51] : memref<8x32xf32, #tpu.memory_space<vmem>>, vector<8x32xf32>
      %c0_52 = arith.constant 0 : index
      %c0_53 = arith.constant 0 : index
      %49 = vector.load %arg13[%c0_52, %c0_53] : memref<8x32xf32, #tpu.memory_space<vmem>>, vector<8x32xf32>
      %50 = vector.extract_strided_slice %38 {offsets = [0, 0], sizes = [8, 32], strides = [1, 1]} : vector<8x128xf32> to vector<8x32xf32>
      %51 = arith.negf %50 : vector<8x32xf32>
      %52 = math.exp %51 : vector<8x32xf32>
      %cst_54 = arith.constant 1.000000e+00 : f32
      %53 = vector.broadcast %cst_54 : f32 to vector<8x32xf32>
      %54 = arith.addf %53, %52 : vector<8x32xf32>
      %55 = arith.divf %53, %54 : vector<8x32xf32>
      %56 = vector.extract_strided_slice %38 {offsets = [0, 32], sizes = [8, 32], strides = [1, 1]} : vector<8x128xf32> to vector<8x32xf32>
      %57 = arith.negf %56 : vector<8x32xf32>
      %58 = math.exp %57 : vector<8x32xf32>
      %cst_55 = arith.constant 1.000000e+00 : f32
      %59 = vector.broadcast %cst_55 : f32 to vector<8x32xf32>
      %60 = arith.addf %59, %58 : vector<8x32xf32>
      %61 = arith.divf %59, %60 : vector<8x32xf32>
      %62 = vector.extract_strided_slice %38 {offsets = [0, 64], sizes = [8, 32], strides = [1, 1]} : vector<8x128xf32> to vector<8x32xf32>
      %63 = math.tanh %62 : vector<8x32xf32>
      %64 = vector.extract_strided_slice %38 {offsets = [0, 96], sizes = [8, 32], strides = [1, 1]} : vector<8x128xf32> to vector<8x32xf32>
      %65 = arith.negf %64 : vector<8x32xf32>
      %66 = math.exp %65 : vector<8x32xf32>
      %cst_56 = arith.constant 1.000000e+00 : f32
      %67 = vector.broadcast %cst_56 : f32 to vector<8x32xf32>
      %68 = arith.addf %67, %66 : vector<8x32xf32>
      %69 = arith.divf %67, %68 : vector<8x32xf32>
      %70 = arith.mulf %61, %49 : vector<8x32xf32>
      %71 = arith.mulf %55, %63 : vector<8x32xf32>
      %72 = arith.addf %70, %71 : vector<8x32xf32>
      %73 = math.tanh %72 : vector<8x32xf32>
      %74 = arith.mulf %69, %73 : vector<8x32xf32>
      %75 = vector.shape_cast %45 : vector<8x1xi1> to vector<8x1xi1>
      %76 = vector.broadcast %75 : vector<8x1xi1> to vector<8x32xi1>
      %77 = arith.select %76, %74, %48 : vector<8x32xi1>, vector<8x32xf32>
      %78 = vector.shape_cast %45 : vector<8x1xi1> to vector<8x1xi1>
      %79 = vector.broadcast %78 : vector<8x1xi1> to vector<8x32xi1>
      %80 = arith.select %79, %72, %49 : vector<8x32xi1>, vector<8x32xf32>
      %c0_57 = arith.constant 0 : index
      %c0_58 = arith.constant 0 : index
      %81 = vector.load %arg14[%c0_57, %c0_58] : memref<8x32xf32, #tpu.memory_space<vmem>>, vector<8x32xf32>
      %c0_59 = arith.constant 0 : index
      %c0_60 = arith.constant 0 : index
      %82 = vector.load %arg15[%c0_59, %c0_60] : memref<8x32xf32, #tpu.memory_space<vmem>>, vector<8x32xf32>
      %83 = vector.extract_strided_slice %43 {offsets = [0, 0], sizes = [8, 32], strides = [1, 1]} : vector<8x128xf32> to vector<8x32xf32>
      %84 = arith.negf %83 : vector<8x32xf32>
      %85 = math.exp %84 : vector<8x32xf32>
      %cst_61 = arith.constant 1.000000e+00 : f32
      %86 = vector.broadcast %cst_61 : f32 to vector<8x32xf32>
      %87 = arith.addf %86, %85 : vector<8x32xf32>
      %88 = arith.divf %86, %87 : vector<8x32xf32>
      %89 = vector.extract_strided_slice %43 {offsets = [0, 32], sizes = [8, 32], strides = [1, 1]} : vector<8x128xf32> to vector<8x32xf32>
      %90 = arith.negf %89 : vector<8x32xf32>
      %91 = math.exp %90 : vector<8x32xf32>
      %cst_62 = arith.constant 1.000000e+00 : f32
      %92 = vector.broadcast %cst_62 : f32 to vector<8x32xf32>
      %93 = arith.addf %92, %91 : vector<8x32xf32>
      %94 = arith.divf %92, %93 : vector<8x32xf32>
      %95 = vector.extract_strided_slice %43 {offsets = [0, 64], sizes = [8, 32], strides = [1, 1]} : vector<8x128xf32> to vector<8x32xf32>
      %96 = math.tanh %95 : vector<8x32xf32>
      %97 = vector.extract_strided_slice %43 {offsets = [0, 96], sizes = [8, 32], strides = [1, 1]} : vector<8x128xf32> to vector<8x32xf32>
      %98 = arith.negf %97 : vector<8x32xf32>
      %99 = math.exp %98 : vector<8x32xf32>
      %cst_63 = arith.constant 1.000000e+00 : f32
      %100 = vector.broadcast %cst_63 : f32 to vector<8x32xf32>
      %101 = arith.addf %100, %99 : vector<8x32xf32>
      %102 = arith.divf %100, %101 : vector<8x32xf32>
      %103 = arith.mulf %94, %82 : vector<8x32xf32>
      %104 = arith.mulf %88, %96 : vector<8x32xf32>
      %105 = arith.addf %103, %104 : vector<8x32xf32>
      %106 = math.tanh %105 : vector<8x32xf32>
      %107 = arith.mulf %102, %106 : vector<8x32xf32>
      %108 = vector.shape_cast %47 : vector<8x1xi1> to vector<8x1xi1>
      %109 = vector.broadcast %108 : vector<8x1xi1> to vector<8x32xi1>
      %110 = arith.select %109, %107, %81 : vector<8x32xi1>, vector<8x32xf32>
      %111 = vector.shape_cast %47 : vector<8x1xi1> to vector<8x1xi1>
      %112 = vector.broadcast %111 : vector<8x1xi1> to vector<8x32xi1>
      %113 = arith.select %112, %105, %82 : vector<8x32xi1>, vector<8x32xf32>
      %c0_64 = arith.constant 0 : index
      %c0_65 = arith.constant 0 : index
      %114 = vector.load %arg12[%c0_64, %c0_65] : memref<8x32xf32, #tpu.memory_space<vmem>>, vector<8x32xf32>
      tpu.vector_store %arg12[%c0_64, %c0_65], %77 {strides = array<i32>} : memref<8x32xf32, #tpu.memory_space<vmem>>, vector<8x32xf32>,
      %c0_66 = arith.constant 0 : index
      %c0_67 = arith.constant 0 : index
      %115 = vector.load %arg13[%c0_66, %c0_67] : memref<8x32xf32, #tpu.memory_space<vmem>>, vector<8x32xf32>
      tpu.vector_store %arg13[%c0_66, %c0_67], %80 {strides = array<i32>} : memref<8x32xf32, #tpu.memory_space<vmem>>, vector<8x32xf32>,
      %c0_68 = arith.constant 0 : index
      %c0_69 = arith.constant 0 : index
      %116 = vector.load %arg14[%c0_68, %c0_69] : memref<8x32xf32, #tpu.memory_space<vmem>>, vector<8x32xf32>
      tpu.vector_store %arg14[%c0_68, %c0_69], %110 {strides = array<i32>} : memref<8x32xf32, #tpu.memory_space<vmem>>, vector<8x32xf32>,
      %c0_70 = arith.constant 0 : index
      %c0_71 = arith.constant 0 : index
      %117 = vector.load %arg15[%c0_70, %c0_71] : memref<8x32xf32, #tpu.memory_space<vmem>>, vector<8x32xf32>
      tpu.vector_store %arg15[%c0_70, %c0_71], %113 {strides = array<i32>} : memref<8x32xf32, #tpu.memory_space<vmem>>, vector<8x32xf32>,
      %118 = arith.index_cast %31 : i32 to index
      %c0_72 = arith.constant 0 : index
      %119 = vector.load %arg16[%118, %c0_72] : memref<64x32xf32, #tpu.memory_space<vmem>>, vector<8x32xf32>
      tpu.vector_store %arg16[%118, %c0_72], %77 {strides = array<i32>} : memref<64x32xf32, #tpu.memory_space<vmem>>, vector<8x32xf32>,
      %120 = arith.index_cast %33 : i32 to index
      %c0_73 = arith.constant 0 : index
      %121 = vector.load %arg17[%120, %c0_73] : memref<64x32xf32, #tpu.memory_space<vmem>>, vector<8x32xf32>
      tpu.vector_store %arg17[%120, %c0_73], %110 {strides = array<i32>} : memref<64x32xf32, #tpu.memory_space<vmem>>, vector<8x32xf32>,
    }
    %c8_i32_32 = arith.constant 8 : i32
    %c0_33 = arith.constant 0 : index
    %c0_34 = arith.constant 0 : index
    %25 = vector.load %arg16[%c0_33, %c0_34] : memref<64x32xf32, #tpu.memory_space<vmem>>, vector<64x32xf32>
    %c0_35 = arith.constant 0 : index
    %c0_36 = arith.constant 0 : index
    %26 = vector.load %arg9[%c0_35, %c0_36] : memref<64x64xf32, #tpu.memory_space<vmem>>, vector<64x32xf32>
    tpu.vector_store %arg9[%c0_35, %c0_36], %25 {strides = array<i32>} : memref<64x64xf32, #tpu.memory_space<vmem>>, vector<64x32xf32>,
    %c0_37 = arith.constant 0 : index
    %c0_38 = arith.constant 0 : index
    %27 = vector.load %arg17[%c0_37, %c0_38] : memref<64x32xf32, #tpu.memory_space<vmem>>, vector<64x32xf32>
    %c0_39 = arith.constant 0 : index
    %c32 = arith.constant 32 : index
    %28 = vector.load %arg9[%c0_39, %c32] : memref<64x64xf32, #tpu.memory_space<vmem>>, vector<64x32xf32>
    tpu.vector_store %arg9[%c0_39, %c32], %27 {strides = array<i32>} : memref<64x64xf32, #tpu.memory_space<vmem>>, vector<64x32xf32>,
    return
  }
  func.func @transform_0(%arg0: i32) -> (i32, i32) {
    %c0_i32 = arith.constant 0 : i32
    %c0_i32_0 = arith.constant 0 : i32
    %c0_i32_1 = arith.constant 0 : i32
    return %c0_i32, %c0_i32_0 : i32, i32
  }
  func.func @transform_1(%arg0: i32) -> (i32, i32) {
    %c0_i32 = arith.constant 0 : i32
    %c0_i32_0 = arith.constant 0 : i32
    %c0_i32_1 = arith.constant 0 : i32
    return %c0_i32, %c0_i32_0 : i32, i32
  }
  func.func @transform_2(%arg0: i32) -> (i32, i32) {
    %c0_i32 = arith.constant 0 : i32
    %c0_i32_0 = arith.constant 0 : i32
    %c0_i32_1 = arith.constant 0 : i32
    return %c0_i32, %c0_i32_0 : i32, i32
  }
  func.func @transform_3(%arg0: i32) -> (i32, i32) {
    %c0_i32 = arith.constant 0 : i32
    %c0_i32_0 = arith.constant 0 : i32
    %c0_i32_1 = arith.constant 0 : i32
    return %c0_i32, %c0_i32_0 : i32, i32
  }
  func.func @transform_4(%arg0: i32) -> (i32, i32) {
    %c0_i32 = arith.constant 0 : i32
    %c0_i32_0 = arith.constant 0 : i32
    %c0_i32_1 = arith.constant 0 : i32
    return %c0_i32, %c0_i32_0 : i32, i32
  }
  func.func @transform_5(%arg0: i32) -> (i32, i32) {
    %c0_i32 = arith.constant 0 : i32
    %c0_i32_0 = arith.constant 0 : i32
    %c0_i32_1 = arith.constant 0 : i32
    return %c0_i32, %c0_i32_0 : i32, i32
  }
  func.func @transform_6(%arg0: i32) -> (i32, i32) {
    %c0_i32 = arith.constant 0 : i32
    %c0_i32_0 = arith.constant 0 : i32
    %c0_i32_1 = arith.constant 0 : i32
    return %c0_i32, %c0_i32_0 : i32, i32
  }
  func.func @transform_7(%arg0: i32) -> (i32, i32) {
    %c0_i32 = arith.constant 0 : i32
    %c0_i32_0 = arith.constant 0 : i32
    %c0_i32_1 = arith.constant 0 : i32
    return %c0_i32, %c0_i32_0 : i32, i32
  }
  func.func @transform_8(%arg0: i32) -> (i32, i32) {
    %c0_i32 = arith.constant 0 : i32
    %c0_i32_0 = arith.constant 0 : i32
    %c0_i32_1 = arith.constant 0 : i32
    return %c0_i32, %c0_i32_0 : i32, i32
  }
}

</mosaic_0001>

<bundles_post_ra>
// kernel: tpu_custom_call.1
= control target key start
LH: loop header
LB: loop body
LE: loop exit
PB: predicated region body
PF: predicated region fallthrough
CT: control target
= control target key end

     0   :  { %13 = vsyncpa [#allocation11], 0  ;;  %vm47_vm0 = vcmask 130048   ;;  %vm316_vm1 = vcmask 261120   ;;  %v882_v17 = vmov 0.0   ;;  %s1133_s0 = inlined_call_operand.vmem [shape: s32[8,1], index: 0, kind: input, shape index: {}]   ;;  %s1134_s1 = inlined_call_operand.vmem [shape: f32[64,16], index: 1, kind: input, shape index: {}]   ;;  %s1135_s2 = inlined_call_operand.vmem [shape: f32[16,128], index: 2, kind: input, shape index: {}]   ;;  %s1136_s3 = inlined_call_operand.vmem [shape: f32[32,128], index: 3, kind: input, shape index: {}]   ;;  %s1137_s4 = inlined_call_operand.vmem [shape: f32[1,128], index: 4, kind: input, shape index: {}]   ;;  %s1138_s5 = inlined_call_operand.vmem [shape: f32[16,128], index: 5, kind: input, shape index: {}]   ;;  %s1139_s6 = inlined_call_operand.vmem [shape: f32[32,128], index: 6, kind: input, shape index: {}]   ;;  %s1140_s7 = inlined_call_operand.vmem [shape: f32[1,128], index: 7, kind: input, shape index: {}]   ;;  %s1141_s8 = inlined_call_operand.hbm [shape: f32[64,64], index: 8, kind: output, shape index: {}]  }
   0x1   :  { %v38_v0 = vld [vmem:[%s1135_s2] sm:$0xff]  ;;  %v39_v1 = vld [vmem:[%s1135_s2 + $0x8] sm:$0xff]  ;;  %v32_v8 = vld [vmem:[%s1134_s1 + $0x10] sm:$0xff]  ;;  %317 = vst.msk [vmem:[#allocation4] sm:$0xff] %vm316_vm1, %v882_v17 }
   0x2   :  { %v792_v2 = vpack.c.bf16 %v39_v1, %v38_v0  ;;  %v185_v3 = vld [vmem:[%s1138_s5] sm:$0xff]  ;;  %v186_v4 = vld [vmem:[%s1138_s5 + $0x8] sm:$0xff]  ;;  %v33_v9 = vld [vmem:[%s1134_s1 + $0x18] sm:$0xff]  ;;  %318 = vst.msk [vmem:[#allocation5] sm:$0xff] %vm316_vm1, %v882_v17 }
   0x3   :  { %v30_v5 = vld [vmem:[%s1134_s1] sm:$0xff]  ;;  %v796_v6 = vpack.c.bf16 %v186_v4, %v185_v3  ;;  %v31_v7 = vld [vmem:[%s1134_s1 + $0x8] sm:$0xff]  ;;  %v36_v12 = vld [vmem:[%s1134_s1 + $0x30] sm:$0xff]  ;;  %319 = vst.msk [vmem:[#allocation6] sm:$0xff] %vm316_vm1, %v882_v17 }
   0x4   :  { %742 = vmatprep.mubr.msk.f32.mxu0 %vm47_vm0, %v30_v5  ;;  %758 = vmatprep.mubr.msk.f32.mxu1 %vm47_vm0, %v30_v5  ;;  %v34_v10 = vld [vmem:[%s1134_s1 + $0x20] sm:$0xff]  ;;  %v35_v11 = vld [vmem:[%s1134_s1 + $0x28] sm:$0xff]  ;;  %v37_v13 = vld [vmem:[%s1134_s1 + $0x38] sm:$0xff]  ;;  %320 = vst.msk [vmem:[#allocation7] sm:$0xff] %vm316_vm1, %v882_v17 }
   0x5   :  { %793 = vmatprep.subr.bf16.mxu0 %v792_v2  ;;  %797 = vmatprep.subr.bf16.mxu1 %v796_v6  ;;  %v994_v14 = vld [vmem:[%s1136_s3] sm:$0xff]  ;;  %v999_v15 = vld [vmem:[%s1136_s3 + $0x8] sm:$0xff]  ;;  %v1004_v16 = vld [vmem:[%s1136_s3 + $0x10] sm:$0xff] }
   0x6   :  { %795 = vmatpush3.bf16.msra.mxu0 %v792_v2  ;;  %799 = vmatpush3.bf16.msra.mxu1 %v796_v6  ;;  %v1013_v18 = vld [vmem:[%s1136_s3 + $0x18] sm:$0xff]  ;;  %v1018_v19 = vld [vmem:[%s1139_s6] sm:$0xff]  ;;  %v1023_v20 = vld [vmem:[%s1139_s6 + $0x8] sm:$0xff] }
   0x7   :  { %v1028_v21 = vld [vmem:[%s1139_s6 + $0x10] sm:$0xff]  ;;  %v1033_v22 = vld [vmem:[%s1139_s6 + $0x18] sm:$0xff]  ;;  %v1038_v23 = vld [vmem:[%s1133_s0] sm:$0xff]  ;;  %s1046_s0 = smov 0  }
   0x8   :  { %v684_v24 = vld [vmem:[%s1137_s4] ss:$0 sm:$0xff] }
   0x9   :  { %743 = vmatmul.mubr.msk.f32.vlgmr.msra.gmra.mrb[0].mxu0 %vm47_vm0, %v31_v7  ;;  %759 = vmatmul.mubr.msk.f32.vlgmr.msra.gmra.mrb[0].mxu1 %vm47_vm0, %v31_v7  ;;  %v693_v25 = vld [vmem:[%s1140_s7] ss:$0 sm:$0xff] }
   0xa   :  { %745 = vmatprep.mubr.msk.f32.mxu0 %vm47_vm0, %v32_v8  ;;  %761 = vmatprep.mubr.msk.f32.mxu1 %vm47_vm0, %v32_v8 }
   0xd   :  { %746 = vmatmul.mubr.msk.f32.gmra.mrb[2].mxu0 %vm47_vm0, %v33_v9  ;;  %762 = vmatmul.mubr.msk.f32.gmra.mrb[2].mxu1 %vm47_vm0, %v33_v9 }
   0xe   :  { %748 = vmatprep.mubr.msk.f32.mxu0 %vm47_vm0, %v34_v10  ;;  %764 = vmatprep.mubr.msk.f32.mxu1 %vm47_vm0, %v34_v10 }
  0x11   :  { %749 = vmatmul.mubr.msk.f32.gmra.mrb[4].mxu0 %vm47_vm0, %v35_v11  ;;  %765 = vmatmul.mubr.msk.f32.gmra.mrb[4].mxu1 %vm47_vm0, %v35_v11 }
  0x12   :  { %751 = vmatprep.mubr.msk.f32.mxu0 %vm47_vm0, %v36_v12  ;;  %767 = vmatprep.mubr.msk.f32.mxu1 %vm47_vm0, %v36_v12 }
  0x15   :  { %752 = vmatmul.mubr.msk.f32.gmra.mrb[6].mxu0 %vm47_vm0, %v37_v13  ;;  %768 = vmatmul.mubr.msk.f32.gmra.mrb[6].mxu1 %vm47_vm0, %v37_v13 }
  0xdc   :  { %v744_v26 = vpop.f32.mrb[0].mxu0  ;;  %v760_v28 = vpop.f32.mrb[0].mxu1 }
  0xdd   :  { %v144_v27 = vadd.f32 %v744_v26, %v684_v24  ;;  %v138_v29 = vpop.f32.mrb[1].mxu0  ;;  %v266_v30 = vadd.f32 %v760_v28, %v693_v25  ;;  %v260_v32 = vpop.f32.mrb[1].mxu1 }
  0xde   :  { %v139_v31 = vadd.f32 %v684_v24, %v138_v29  ;;  %v261_v33 = vadd.f32 %v693_v25, %v260_v32 }
  0xdf   :  { %178 = vst [vmem:[#allocation2 + $0x8] sm:$0xff] %v144_v27  ;;  %300 = vst [vmem:[#allocation3 + $0x8] sm:$0xff] %v266_v30 }
  0xe0   :  { %177 = vst [vmem:[#allocation2] sm:$0xff] %v139_v31  ;;  %v747_v34 = vpop.f32.mrb[2].mxu0  ;;  %299 = vst [vmem:[#allocation3] sm:$0xff] %v261_v33  ;;  %v763_v36 = vpop.f32.mrb[2].mxu1 }
  0xe1   :  { %v154_v35 = vadd.f32 %v747_v34, %v684_v24  ;;  %v148_v37 = vpop.f32.mrb[3].mxu0  ;;  %v276_v38 = vadd.f32 %v763_v36, %v693_v25  ;;  %v270_v40 = vpop.f32.mrb[3].mxu1 }
  0xe2   :  { %v149_v39 = vadd.f32 %v684_v24, %v148_v37  ;;  %v271_v41 = vadd.f32 %v693_v25, %v270_v40 }
  0xe3   :  { %180 = vst [vmem:[#allocation2 + $0x18] sm:$0xff] %v154_v35  ;;  %302 = vst [vmem:[#allocation3 + $0x18] sm:$0xff] %v276_v38 }
  0xe4   :  { %179 = vst [vmem:[#allocation2 + $0x10] sm:$0xff] %v149_v39  ;;  %v750_v42 = vpop.f32.mrb[4].mxu0  ;;  %301 = vst [vmem:[#allocation3 + $0x10] sm:$0xff] %v271_v41  ;;  %v766_v44 = vpop.f32.mrb[4].mxu1 }
  0xe5   :  { %v164_v43 = vadd.f32 %v750_v42, %v684_v24  ;;  %v158_v45 = vpop.f32.mrb[5].mxu0  ;;  %v286_v46 = vadd.f32 %v766_v44, %v693_v25  ;;  %v280_v48 = vpop.f32.mrb[5].mxu1 }
  0xe6   :  { %v159_v47 = vadd.f32 %v684_v24, %v158_v45  ;;  %v281_v49 = vadd.f32 %v693_v25, %v280_v48 }
  0xe7   :  { %182 = vst [vmem:[#allocation2 + $0x28] sm:$0xff] %v164_v43  ;;  %304 = vst [vmem:[#allocation3 + $0x28] sm:$0xff] %v286_v46 }
  0xe8   :  { %181 = vst [vmem:[#allocation2 + $0x20] sm:$0xff] %v159_v47  ;;  %v753_v50 = vpop.f32.mrb[6].mxu0  ;;  %303 = vst [vmem:[#allocation3 + $0x20] sm:$0xff] %v281_v49  ;;  %v769_v52 = vpop.f32.mrb[6].mxu1 }
  0xe9   :  { %v174_v51 = vadd.f32 %v753_v50, %v684_v24  ;;  %v168_v53 = vpop.f32.mrb[7].mxu0  ;;  %v296_v54 = vadd.f32 %v769_v52, %v693_v25  ;;  %v290_v56 = vpop.f32.mrb[7].mxu1 }
  0xea   :  { %v169_v55 = vadd.f32 %v684_v24, %v168_v53  ;;  %v291_v57 = vadd.f32 %v693_v25, %v290_v56 }
  0xeb   :  { %184 = vst [vmem:[#allocation2 + $0x38] sm:$0xff] %v174_v51  ;;  %306 = vst [vmem:[#allocation3 + $0x38] sm:$0xff] %v296_v54 }
  0xec   :  { %183 = vst [vmem:[#allocation2 + $0x30] sm:$0xff] %v169_v55  ;;  %305 = vst [vmem:[#allocation3 + $0x30] sm:$0xff] %v291_v57 }
  0xed LB: > { %v801_v58 = vpack.c.bf16 %v999_v15, %v994_v14  ;;  %v807_v59 = vpack.c.bf16 %v1023_v20, %v1018_v19  ;;  %v883_v60 = vmov 0.0|0.0   ;;  %v804_v61 = vpack.c.bf16 %v1013_v18, %v1004_v16  ;;  %v488_v63 = vld [vmem:[#allocation5] sm:$0xff]  ;;  %s886_s4 = smov 32   ;;  %v1060_v1 = vld [vmem:[#allocation4] sm:$0xff]  ;;  %v1062_v2 = vld [vmem:[#allocation6] sm:$0xff]  ;;  %s327_s6 = ssub.s32 7, %s880_s0  ;;  %s880_s0 = sphi %s1046_s0, %s326_s0  }
  0xee   : > { %800 = vmatprep.subr.bf16.mxu0 %v883_v60  ;;  %806 = vmatprep.subr.bf16.mxu1 %v883_v60  ;;  %v810_v62 = vpack.c.bf16 %v1033_v22, %v1028_v21  ;;  %vm884_vm2 = vmmov 0   ;;  %v885_v0 = vmov 0.0   ;;  %v527_v3 = vld [vmem:[#allocation7] sm:$0xff]  ;;  %s702_s7 = sshll.u32 %s880_s0, 3  ;;  %s1073_s23 = sshll.u32 %s327_s6, 3  ;;  %v887_v12 = vmov 0  }
  0xef   : > { %802 = vmatpush3.bf16.msra.mxu0 %v801_v58  ;;  %808 = vmatpush3.bf16.msra.mxu1 %v807_v59  ;;  %s330_s24 = scalar_lea.vmem [#allocation2], %s702_s7  ;;  %s407_s25 = scalar_lea.vmem [#allocation3], %s1073_s23  ;;  %v484_v30 = vstv %s880_s0  ;;  %v486_v34 = vstv %s327_s6 }
  0xf0   : > { %803 = vmatprep.subr.bf16.mxu0 %v883_v60  ;;  %778 = vmatprep.mubr.msk.f32.mxu0 %vm884_vm2, %v885_v0  ;;  %s888_s26 = smov 64   ;;  %vm485_vm3 = vcmp.lt.s32.totalorder %v484_v30, %v1038_v23  ;;  %vm487_vm4 = vcmp.lt.s32.totalorder %v486_v34, %v1038_v23  ;;  %s889_s27 = smov 96  }
  0xf1   : > { %809 = vmatprep.subr.bf16.mxu1 %v883_v60  ;;  %789 = vmatprep.mubr.msk.f32.mxu1 %vm884_vm2, %v885_v0  ;;  %v517_v37 = vsel %vm485_vm3, 1, %v887_v12  ;;  %v556_v39 = vsel %vm487_vm4, 1, %v887_v12  ;;  %s586_s28 = scalar_lea.vmem [#allocation8], %s702_s7  ;;  %s588_s29 = scalar_lea.vmem [#allocation9], %s1073_s23 }
  0xf2   : > { %497 = vrot.lane.b32.xlu1 %v488_v63, %s886_s4  ;;  %832 = vset.pattern.permute.xlu0 %v887_v12  ;;  %s326_s0 = sadd.s32 1, %s880_s0  }
  0xf3   : > { %805 = vmatpush3.bf16.msra.mxu0 %v804_v61  ;;  %811 = vmatpush3.bf16.msra.mxu1 %v810_v62  ;;  %v331_v4 = vld [vmem:[%s330_s24] sm:$0xff]  ;;  %p323_p0 = scmp.ge.s32.totalorder %s326_s0, 8  }
  0xf4   : > { %v408_v5 = vld [vmem:[%s407_s25] sm:$0xff]  ;;  %833 = vset.pattern.permute.xlu1 %v887_v12  ;;  %s890_s30 = smov (%p323_p0), 32   ;;  %vm646_vm7 = vcmask (%p323_p0), 523520   ;;  %s891_s9 = smov (%p323_p0), [#allocation10]  }
  0xf5   :  { %s660_s10 = sshll.u32 (%p323_p0), %s891_s9, 4  ;;  %s661_s10 = int_to_ptr.vmem [resolvable:$true] %s660_s10 }
  0xf6   : > { %779 = vmatmul.mubr.msk.f32.vlgmr.msra.gmra.mrb[0].mxu0 %vm316_vm1, %v1060_v1  ;;  %790 = vmatmul.mubr.msk.f32.vlgmr.msra.gmra.mrb[0].mxu1 %vm316_vm1, %v1062_v2  ;;  %s850_s1 = scalar_lea.vmem (%p323_p0), %s661_s10, 1024  ;;  %p855_p2 = scmp.lt.s32.totalorder (%p323_p0), %s661_s10, %s661_s10 }
  0xf7   : > { %536 = vrot.lane.b32.xlu1 %v527_v3, %s886_s4  ;;  %p851_p1 = scmp.ne.s32.totalorder (%p323_p0), %s661_s10, %s850_s1  ;;  %p856_p3 = scmp.lt.s32.totalorder (%p323_p0), %s850_s1, %s850_s1 }
  0xf9   :  { %p857_p4 = por (%p323_p0), %p856_p3, %p855_p2 }
  0xfb   :  { %p858_p5 = pnand (%p323_p0), %p857_p4, %p851_p1 }
 0x164   : > { %v498_v40 = vpop.permute.xlu1 %497 }
 0x169   : > { %v537_v42 = vpop.permute.xlu1 %536 }
 0x1c9   : > { %v402_v6 = vpop.f32.mrb[0].mxu0  ;;  %v479_v7 = vpop.f32.mrb[0].mxu1 }
 0x1ca   : > { %v406_v8 = vadd.f32 %v402_v6, %v331_v4  ;;  %v780_v9 = vpop.f32.mrb[1].mxu0  ;;  %v483_v10 = vadd.f32 %v479_v7, %v408_v5  ;;  %v791_v11 = vpop.f32.mrb[1].mxu1 }
 0x1cc   : > { %834 = vtanh.f32 %v406_v8  ;;  %v706_v24 = vmul.f32 -1.442695, %v406_v8  ;;  %v707_v25 = vmul.f32 -1.442695, %v483_v10 }
 0x1cd   : > { %836 = vtanh.f32 %v483_v10 }
 0x1ce   : > { %838 = vpow2.f32 %v706_v24 }
 0x1cf   : > { %840 = vpow2.f32 %v707_v25 }
 0x1d6   : > { %v835_v13 = vpop.eup %834 }
 0x1d7   : > { %502 = vrot.lane.b32.xlu0 %v835_v13, %s888_s26  ;;  %v837_v17 = vpop.eup %836 }
 0x1d8   : > { %v839_v26 = vpop.eup %838 }
 0x1d9   : > { %v492_v27 = vadd.f32 1.0, %v839_v26  ;;  %v841_v28 = vpop.eup %840 }
 0x1da   : > { %v531_v29 = vadd.f32 1.0, %v841_v28 }
 0x1db   : > { %541 = vrot.lane.b32.xlu0 %v837_v17, %s888_s26  ;;  %842 = vrcp.f32 %v492_v27 }
 0x1dc   : > { %844 = vrcp.f32 %v531_v29 }
 0x1e5   : > { %v843_v31 = vpop.eup %842 }
 0x1e6   : > { %v845_v35 = vpop.eup %844  ;;  %v500_v41 = vmul.f32 %v843_v31, %v498_v40 }
 0x1e7   : > { %v539_v45 = vmul.f32 %v845_v35, %v537_v42 }
 0x249   : > { %v503_v32 = vpop.permute.xlu0 %502 }
 0x24a   : > { %v505_v33 = vmul.f32 %v843_v31, %v503_v32 }
 0x24c   : > { %507 = vrot.lane.b32.xlu0 %v505_v33, %s886_s4 }
 0x24d   : > { %v542_v36 = vpop.permute.xlu0 %541 }
 0x24e   : > { %v544_v38 = vmul.f32 %v845_v35, %v542_v36 }
 0x250   : > { %519 = vperm.xlu0 %832, %v517_v37   ;;  %546 = vrot.lane.b32.xlu1 %v544_v38, %s886_s4 }
 0x254   : > { %558 = vperm.xlu1 %833, %v556_v39  }
 0x2be   : > { %v508_v43 = vpop.permute.xlu0 %507 }
 0x2bf   : > { %v510_v44 = vadd.f32 %v508_v43, %v500_v41 }
 0x2c1   : > { %846 = vtanh.f32 %v510_v44 }
 0x2c2   : > { %v547_v46 = vpop.permute.xlu1 %546 }
 0x2c3   : > { %v549_v47 = vadd.f32 %v547_v46, %v539_v45 }
 0x2c5   : > { %848 = vtanh.f32 %v549_v47 }
 0x2cb   : > { %v847_v48 = vpop.eup %846 }
 0x2cc   : > { %513 = vrot.lane.b32.xlu1 %v847_v48, %s888_s26 }
 0x2cf   : > { %v849_v49 = vpop.eup %848  ;;  %v520_v50 = vpop.permute.xlu0 %519 }
 0x2d0   : > { %522 = vrot.lane.b32.xlu1 %v1060_v1, %s889_s27  ;;  %552 = vrot.lane.b32.xlu0 %v849_v49, %s888_s26  ;;  %vm521_vm5 = vcmp.eq.s32.totalorder %v520_v50, 1 }
 0x2d1   : > { %v526_v52 = vsel %vm521_vm5, %v510_v44, %v498_v40 }
 0x2d3   : > { %v559_v51 = vpop.permute.xlu1 %558 }
 0x2d4   : > { %561 = vrot.lane.b32.xlu0 %v1062_v2, %s889_s27  ;;  %vm560_vm6 = vcmp.eq.s32.totalorder %v559_v51, 1 }
 0x2d5   : > { %v565_v53 = vsel %vm560_vm6, %v549_v47, %v537_v42 }
 0x2d8   : > { %572 = vrot.lane.b32.xlu0 %v526_v52, %s889_s27 }
 0x2dc   : > { %582 = vrot.lane.b32.xlu0 %v565_v53, %s889_s27 }
 0x33e   : > { %v514_v54 = vpop.permute.xlu1 %513 }
 0x33f   : > { %v516_v55 = vmul.f32 %v843_v31, %v514_v54 }
 0x342   : > { %v523_v56 = vpop.permute.xlu1 %522  ;;  %v553_v57 = vpop.permute.xlu0 %552 }
 0x343   : > { %v525_v58 = vsel %vm521_vm5, %v516_v55, %v523_v56  ;;  %v555_v59 = vmul.f32 %v845_v35, %v553_v57 }
 0x344   : > { %567 = vrot.lane.b32.xlu1 %v525_v58, %s886_s4 }
 0x346   : > { %v562_v60 = vpop.permute.xlu0 %561 }
 0x347   : > { %v564_v61 = vsel %vm560_vm6, %v555_v59, %v562_v60 }
 0x348   : > { %577 = vrot.lane.b32.xlu1 %v564_v61, %s886_s4 }
 0x34a   : > { %v573_v62 = vpop.permute.xlu0 %572 }
 0x34b   : > { %575 = vst.msk [vmem:[#allocation5] sm:$0xff] %vm316_vm1, %v573_v62 }
 0x34e   : > { %v583_v63 = vpop.permute.xlu0 %582 }
 0x34f   : > { %585 = vst.msk [vmem:[#allocation7] sm:$0xff] %vm316_vm1, %v583_v63 }
 0x3b5   :  { %325 = sbr.rel (!%p323_p0) target bundleno = 237 (0xed), region = 63 }
 0x3b6   : > { %v568_v0 = vpop.permute.xlu1 %567 }
 0x3b7   : > { %570 = vst.msk [vmem:[#allocation4] sm:$0xff] %vm316_vm1, %v568_v0  ;;  %587 = vst.msk [vmem:[%s586_s28] sm:$0xff] %vm316_vm1, %v568_v0 }
 0x3ba   : > { %v578_v1 = vpop.permute.xlu1 %577 }
 0x3bb   : > { %580 = vst.msk [vmem:[#allocation6] sm:$0xff] %vm316_vm1, %v578_v1  ;;  %589 = vst.msk [vmem:[%s588_s29] sm:$0xff] %vm316_vm1, %v578_v1 }
 0x3be   :  { %v592_v6 = vld [vmem:[#allocation8 + $0x10] sm:$0xff]  ;;  %v590_v7 = vld [vmem:[#allocation8] sm:$0xff]  ;;  %v593_v8 = vld [vmem:[#allocation8 + $0x18] sm:$0xff] }
 0x3bf   :  { %600 = vst.msk [vmem:[#allocation10 + $0x10] sm:$0xff] %vm316_vm1, %v592_v6  ;;  %v591_v9 = vld [vmem:[#allocation8 + $0x8] sm:$0xff]  ;;  %598 = vst.msk [vmem:[#allocation10] sm:$0xff] %vm316_vm1, %v590_v7  ;;  %v594_v14 = vld [vmem:[#allocation8 + $0x20] sm:$0xff] }
 0x3c0   :  { %601 = vst.msk [vmem:[#allocation10 + $0x18] sm:$0xff] %vm316_vm1, %v593_v8  ;;  %599 = vst.msk [vmem:[#allocation10 + $0x8] sm:$0xff] %vm316_vm1, %v591_v9  ;;  %v595_v10 = vld [vmem:[#allocation8 + $0x28] sm:$0xff]  ;;  %v597_v15 = vld [vmem:[#allocation8 + $0x38] sm:$0xff] }
 0x3c1   :  { %603 = vst.msk [vmem:[#allocation10 + $0x28] sm:$0xff] %vm316_vm1, %v595_v10  ;;  %602 = vst.msk [vmem:[#allocation10 + $0x20] sm:$0xff] %vm316_vm1, %v594_v14  ;;  %v596_v16 = vld [vmem:[#allocation8 + $0x30] sm:$0xff] }
 0x3c2   :  { %v608_v2 = vld [vmem:[#allocation9 + $0x10] sm:$0xff]  ;;  %v606_v3 = vld [vmem:[#allocation9] sm:$0xff]  ;;  %v609_v4 = vld [vmem:[#allocation9 + $0x18] sm:$0xff]  ;;  %605 = vst.msk [vmem:[#allocation10 + $0x38] sm:$0xff] %vm316_vm1, %v597_v15 }
 0x3c3   :  { %626 = vrot.lane.b32.xlu1 %v608_v2, %s890_s30  ;;  %622 = vrot.lane.b32.xlu0 %v606_v3, %s890_s30  ;;  %v607_v5 = vld [vmem:[#allocation9 + $0x8] sm:$0xff]  ;;  %v610_v19 = vld [vmem:[#allocation9 + $0x20] sm:$0xff]  ;;  %604 = vst.msk [vmem:[#allocation10 + $0x30] sm:$0xff] %vm316_vm1, %v596_v16  ;;  %v613_v20 = vld [vmem:[#allocation9 + $0x38] sm:$0xff] }
 0x3c4   :  { %v611_v18 = vld [vmem:[#allocation9 + $0x28] sm:$0xff]  ;;  %v612_v21 = vld [vmem:[#allocation9 + $0x30] sm:$0xff] }
 0x3c7   :  { %628 = vrot.lane.b32.xlu1 %v609_v4, %s890_s30  ;;  %624 = vrot.lane.b32.xlu0 %v607_v5, %s890_s30 }
 0x3cb   :  { %632 = vrot.lane.b32.xlu1 %v611_v18, %s890_s30  ;;  %630 = vrot.lane.b32.xlu0 %v610_v19, %s890_s30 }
 0x3cf   :  { %636 = vrot.lane.b32.xlu1 %v613_v20, %s890_s30  ;;  %634 = vrot.lane.b32.xlu0 %v612_v21, %s890_s30 }
 0x435   :  { %v627_v22 = vpop.permute.xlu1 %626  ;;  %v623_v23 = vpop.permute.xlu0 %622 }
 0x436   :  { %649 = vst.msk [vmem:[#allocation10 + $0x10] sm:$0xff] %vm646_vm7, %v627_v22  ;;  %647 = vst.msk [vmem:[#allocation10] sm:$0xff] %vm646_vm7, %v623_v23 }
 0x439   :  { %v629_v11 = vpop.permute.xlu1 %628  ;;  %v625_v12 = vpop.permute.xlu0 %624 }
 0x43a   :  { %650 = vst.msk [vmem:[#allocation10 + $0x18] sm:$0xff] %vm646_vm7, %v629_v11  ;;  %648 = vst.msk [vmem:[#allocation10 + $0x8] sm:$0xff] %vm646_vm7, %v625_v12 }
 0x43d   :  { %v633_v13 = vpop.permute.xlu1 %632  ;;  %v631_v17 = vpop.permute.xlu0 %630 }
 0x43e   :  { %652 = vst.msk [vmem:[#allocation10 + $0x28] sm:$0xff] %vm646_vm7, %v633_v13  ;;  %651 = vst.msk [vmem:[#allocation10 + $0x20] sm:$0xff] %vm646_vm7, %v631_v17 }
 0x441   :  { %v637_v24 = vpop.permute.xlu1 %636  ;;  %v635_v25 = vpop.permute.xlu0 %634 }
 0x442   :  { %654 = vst.msk [vmem:[#allocation10 + $0x38] sm:$0xff] %vm646_vm7, %v637_v24  ;;  %653 = vst.msk [vmem:[#allocation10 + $0x30] sm:$0xff] %vm646_vm7, %v635_v25 }
 0x443   :  { %861 = shalt.err (!%p858_p5)
}
 0x444   :  { %s862_s13 = scalar_lea.hbm %s1141_s8, 1024 }
 0x445   :  { %p863_p6 = scmp.ne.s32.totalorder %s1141_s8, %s862_s13  ;;  %p866_p7 = scmp.lt.u32.totalorder %s862_s13, %s1141_s8 }
 0x447   :  { %p868_p8 = pnand %p866_p7, %p863_p6 }
 0x449   :  { %871 = shalt.err (!%p868_p8)
}
 0x44a   :  { %s892_s17 = smov 128   ;;  %s893_s5 = smov 8  }
 0x44b   :  { %666 = dma.vmem_to_hbm [thread:$0]  %s661_s10, 1024, %s1141_s8, [#allocation11], %s892_s17, %s892_s17, %s893_s5  }
 0x44c   :  { %876 = dma.done.wait [#allocation11], 1024  }
 0x44d   :  { %877 = vsyncadd [#allocation11], 4294966272 }
 0x44e   :  { %670 = vsyncpa [#allocation11], 1 }

</bundles_post_ra>
